<compile_context>
chip_gen: v6e
topology: v6e:2x2x1
jax: 0.10.0
libtpu: 0.0.40
codegen_flags: <defaults>
</compile_context>

<pallas_src>
import functools

import jax
import jax.numpy as jnp
from jax import lax
from jax.experimental import pallas as pl
from jax.experimental.pallas import tpu as pltpu


# ------------------------------ tiled linear ---------------------------------
def _linear_kernel(x_ref, w_ref, o_ref, acc_ref):
    @pl.when(pl.program_id(2) == 0)
    def _():
        acc_ref[...] = jnp.zeros_like(acc_ref)

    acc_ref[...] += jnp.dot(
        x_ref[...], w_ref[...], preferred_element_type=jnp.float32
    )

    @pl.when(pl.program_id(2) == pl.num_programs(2) - 1)
    def _():
        o_ref[...] = acc_ref[...].astype(o_ref.dtype)


def _linear_bias_kernel(x_ref, w_ref, b_ref, o_ref, acc_ref):
    @pl.when(pl.program_id(2) == 0)
    def _():
        acc_ref[...] = jnp.zeros_like(acc_ref)

    acc_ref[...] += jnp.dot(
        x_ref[...], w_ref[...], preferred_element_type=jnp.float32
    )

    @pl.when(pl.program_id(2) == pl.num_programs(2) - 1)
    def _():
        o_ref[...] = (acc_ref[...] + b_ref[...]).astype(o_ref.dtype)


def linear(x2d, w_t, b=None, *, out_dtype=None, tm=256, tn=256, tk=256):
    """x2d: (M, K), w_t: (K, Nout), optional b: (Nout,) -> (M, Nout)."""
    M, K = x2d.shape
    Kw, Nout = w_t.shape
    assert K == Kw
    out_dtype = out_dtype or x2d.dtype

    tm, tn, tk = min(tm, M), min(tn, Nout), min(tk, K)
    # TODO(synk): pad M/K/Nout to tile multiples for shapes that don't divide.
    assert M % tm == 0 and Nout % tn == 0 and K % tk == 0
    grid = (M // tm, Nout // tn, K // tk)

    x_spec = pl.BlockSpec((tm, tk), lambda i, j, k: (i, k))
    w_spec = pl.BlockSpec((tk, tn), lambda i, j, k: (k, j))
    o_spec = pl.BlockSpec((tm, tn), lambda i, j, k: (i, j))
    compiler_params = pltpu.CompilerParams(
        dimension_semantics=("parallel", "parallel", "arbitrary")
    )
    scratch = [pltpu.VMEM((tm, tn), jnp.float32)]

    if b is None:
        return pl.pallas_call(
            _linear_kernel,
            out_shape=jax.ShapeDtypeStruct((M, Nout), out_dtype),
            grid=grid,
            in_specs=[x_spec, w_spec],
            out_specs=o_spec,
            scratch_shapes=scratch,
            compiler_params=compiler_params,
        )(x2d, w_t)

    b2d = b.reshape(1, Nout)
    b_spec = pl.BlockSpec((1, tn), lambda i, j, k: (0, j))
    return pl.pallas_call(
        _linear_bias_kernel,
        out_shape=jax.ShapeDtypeStruct((M, Nout), out_dtype),
        grid=grid,
        in_specs=[x_spec, w_spec, b_spec],
        out_specs=o_spec,
        scratch_shapes=scratch,
        compiler_params=compiler_params,
    )(x2d, w_t, b2d)


# --------------------------- attention core kernel ---------------------------
def _attention_kernel(q_ref, k_ref, v_ref, o_ref, attn_ref, *, scale):
    # Fold the scale into q: N*D multiplies instead of N*N on the score tile.
    q = q_ref[...] * scale          # (N, D) bf16
    k = k_ref[...]                  # (N, D) bf16
    v = v_ref[...]                  # (N, D) bf16

    # QK^T as a contraction on the D axis of both operands (no explicit k.T).
    s = lax.dot_general(
        q, k, (((1,), (1,)), ((), ())),
        preferred_element_type=jnp.float32,
    )                               # (N, N) f32

    # Softmax in f32 (required on v5e; cheap everywhere).
    s = s - jnp.max(s, axis=-1, keepdims=True)
    p = jnp.exp(s)
    denom = jnp.sum(p, axis=-1, keepdims=True)
    p = p * pl.reciprocal(denom, approx=True)   # EUP reciprocal instead of divide

    attn_ref[...] = p.astype(attn_ref.dtype)
    # attn_drop: p=0.0 -> identity
    o_ref[...] = jnp.dot(
        p.astype(v.dtype), v, preferred_element_type=jnp.float32
    ).astype(o_ref.dtype)


def attention_core(qkv, *, num_heads, scale,
                   out_dtype=jnp.bfloat16, attn_dtype=jnp.float32):
    """qkv: (B, N, 3C) -> o: (B, N, C) in output layout, attn: (B, H, N, N)."""
    B, N, threeC = qkv.shape
    C = threeC // 3
    H = num_heads
    D = C // H

    kern = functools.partial(_attention_kernel, scale=scale)
    o, attn = pl.pallas_call(
        kern,
        out_shape=(
            jax.ShapeDtypeStruct((B, N, C), out_dtype),
            jax.ShapeDtypeStruct((B, H, N, N), attn_dtype),
        ),
        grid=(B, H),
        in_specs=[
            # q / k / v head tiles read straight out of the (B, N, 3C) qkv tensor;
            # the head/qkv split lives entirely in the index_map (no HBM transpose).
            pl.BlockSpec((None, N, D), lambda b, h: (b, 0, h)),          # q, head h
            pl.BlockSpec((None, N, D), lambda b, h: (b, 0, H + h)),      # k, head h
            pl.BlockSpec((None, N, D), lambda b, h: (b, 0, 2 * H + h)),  # v, head h
        ],
        out_specs=(
            # o written directly in (B, N, C) layout: head h -> columns [h*D, (h+1)*D)
            pl.BlockSpec((None, N, D), lambda b, h: (b, 0, h)),
            pl.BlockSpec((None, None, N, N), lambda b, h: (b, h, 0, 0)),
        ),
        compiler_params=pltpu.CompilerParams(
            dimension_semantics=("parallel", "parallel")
        ),
    )(qkv, qkv, qkv)
    return o, attn


# ------------------------------- full forward --------------------------------
def vit_attention_forward(x, params, num_heads):
    B, N, C = x.shape
    D = C // num_heads
    scale = D ** (-0.5)  # qk_scale=None -> head_dim ** -0.5

    # bf16 MXU operands, f32 accumulation everywhere.
    x2d = x.reshape(B * N, C).astype(jnp.bfloat16)
    w_qkv_t = params["w_qkv"].T.astype(jnp.bfloat16)    # (C, 3C)
    w_proj_t = params["w_proj"].T.astype(jnp.bfloat16)  # (C, C)

    # qkv = nn.Linear(C, 3C, bias=False)  -> no bias operand at all.
    qkv = linear(x2d, w_qkv_t, b=None, out_dtype=jnp.bfloat16)   # (B*N, 3C)
    qkv = qkv.reshape(B, N, 3 * C)                               # free reshape

    # Attention core: output already in (B, N, C) layout (no transpose after).
    o, attn = attention_core(qkv, num_heads=num_heads, scale=scale,
                             out_dtype=jnp.bfloat16, attn_dtype=x.dtype)

    # proj = nn.Linear(C, C) with bias; final output in x's dtype.
    out = linear(o.reshape(B * N, C), w_proj_t, params["b_proj"],
                 out_dtype=x.dtype).reshape(B, N, C)
    # proj_drop: p=0.0 -> identity
    return out, attn


# ------------------------------ reference (JAX) -------------------------------
def _reference(x, params, num_heads):
    B, N, C = x.shape
    D = C // num_heads
    scale = D ** (-0.5)
    qkv = x @ params["w_qkv"].T                       # no qkv bias
    qkv = qkv.reshape(B, N, 3, num_heads, D).transpose(2, 0, 3, 1, 4)
    q, k, v = qkv[0], qkv[1], qkv[2]
    attn = jnp.einsum("bhnd,bhmd->bhnm", q, k) * scale
    attn = jax.nn.softmax(attn, axis=-1)
    o = jnp.einsum("bhnm,bhmd->bhnd", attn, v)
    o = o.transpose(0, 2, 1, 3).reshape(B, N, C)
    o = o @ params["w_proj"].T + params["b_proj"]
    return o, attn


if __name__ == "__main__":
    # Small but TPU-friendly shapes: lane-aligned head dim and token count.
    B, N, C = 2, 128, 512
    num_heads = 4  # head_dim D = 128

    key = jax.random.PRNGKey(0)
    kx, kq, kp, kb = jax.random.split(key, 4)

    x = jax.random.normal(kx, (B, N, C), dtype=jnp.float32)
    params = {
        # nn.Linear stores weight as (out_features, in_features)
        "w_qkv": 0.02 * jax.random.normal(kq, (3 * C, C), dtype=jnp.float32),
        "w_proj": 0.02 * jax.random.normal(kp, (C, C), dtype=jnp.float32),
        "b_proj": 0.01 * jax.random.normal(kb, (C,), dtype=jnp.float32),
    }

    out, attn = vit_attention_forward(x, params, num_heads)
    out = jax.block_until_ready(out)
    attn = jax.block_until_ready(attn)

    ref_out, ref_attn = _reference(x, params, num_heads)
    assert out.shape == (B, N, C)
    assert attn.shape == (B, num_heads, N, N)
    # bf16 MXU operands + approx reciprocal -> compare at bf16-level tolerance.
    assert jnp.allclose(out.astype(jnp.float32), ref_out, rtol=2e-2, atol=2e-2)
    assert jnp.allclose(attn.astype(jnp.float32), ref_attn, rtol=2e-2, atol=2e-2)

    print("KERNEL_OK")
</pallas_src>

<mosaic_0001>
module attributes {stable_mosaic.version = 11 : i64} {
  func.func @_linear_kernel(%arg0: i32, %arg1: i32, %arg2: i32, %arg3: memref<256x256xbf16, #tpu.memory_space<vmem>>, %arg4: memref<256x256xbf16, #tpu.memory_space<vmem>>, %arg5: memref<256x256xbf16, #tpu.memory_space<vmem>>, %arg6: memref<256x256xf32, #tpu.memory_space<vmem>>) attributes {dimension_semantics = [#tpu.dimension_semantics<parallel>, #tpu.dimension_semantics<parallel>, #tpu.dimension_semantics<arbitrary>], iteration_bounds = array<i64: 1, 6, 2>, scalar_prefetch = 0 : i64, scratch_operands = 1 : i64, tpu.core_type = #tpu.core_type<tc>, window_params = [{transform_indices = @transform_0, window_bounds = array<i64: 256, 256>}, {transform_indices = @transform_1, window_bounds = array<i64: 256, 256>}, {transform_indices = @transform_2, window_bounds = array<i64: 256, 256>}]} {
    %c0_i32 = arith.constant 0 : i32
    %0 = arith.cmpi eq, %arg2, %c0_i32 : i32
    %1 = arith.extui %0 : i1 to i32
    %c0_i32_0 = arith.constant 0 : i32
    %2 = arith.cmpi ne, %1, %c0_i32_0 : i32
    scf.if %2 {
      %cst_9 = arith.constant 0.000000e+00 : f32
      %12 = vector.broadcast %cst_9 : f32 to vector<256x256xf32>
      %c0_10 = arith.constant 0 : index
      %c0_11 = arith.constant 0 : index
      %13 = vector.load %arg6[%c0_10, %c0_11] : memref<256x256xf32, #tpu.memory_space<vmem>>, vector<256x256xf32>
      tpu.vector_store %arg6[%c0_10, %c0_11], %12 {strides = array<i32>} : memref<256x256xf32, #tpu.memory_space<vmem>>, vector<256x256xf32>,
    } else {
    }
    %c0 = arith.constant 0 : index
    %c0_1 = arith.constant 0 : index
    %3 = vector.load %arg6[%c0, %c0_1] : memref<256x256xf32, #tpu.memory_space<vmem>>, vector<256x256xf32>
    %c0_2 = arith.constant 0 : index
    %c0_3 = arith.constant 0 : index
    %4 = vector.load %arg3[%c0_2, %c0_3] : memref<256x256xbf16, #tpu.memory_space<vmem>>, vector<256x256xbf16>
    %c0_4 = arith.constant 0 : index
    %c0_5 = arith.constant 0 : index
    %5 = vector.load %arg4[%c0_4, %c0_5] : memref<256x256xbf16, #tpu.memory_space<vmem>>, vector<256x256xbf16>
    %cst = arith.constant dense<0.000000e+00> : vector<256x256xf32>
    %6 = tpu.matmul %4, %5, %cst {dimension_numbers = #tpu.dot_dimension_numbers<[1], [0], [0], [1], [0, 0, 1, 1], [], []>} : vector<256x256xbf16>, vector<256x256xbf16>, vector<256x256xf32> -> vector<256x256xf32>
    %7 = arith.addf %3, %6 : vector<256x256xf32>
    %c0_6 = arith.constant 0 : index
    %c0_7 = arith.constant 0 : index
    %8 = vector.load %arg6[%c0_6, %c0_7] : memref<256x256xf32, #tpu.memory_space<vmem>>, vector<256x256xf32>
    tpu.vector_store %arg6[%c0_6, %c0_7], %7 {strides = array<i32>} : memref<256x256xf32, #tpu.memory_space<vmem>>, vector<256x256xf32>,
    %c1_i32 = arith.constant 1 : i32
    %9 = arith.cmpi eq, %arg2, %c1_i32 : i32
    %10 = arith.extui %9 : i1 to i32
    %c0_i32_8 = arith.constant 0 : i32
    %11 = arith.cmpi ne, %10, %c0_i32_8 : i32
    scf.if %11 {
      %c0_9 = arith.constant 0 : index
      %c0_10 = arith.constant 0 : index
      %12 = vector.load %arg6[%c0_9, %c0_10] : memref<256x256xf32, #tpu.memory_space<vmem>>, vector<256x256xf32>
      %13 = arith.truncf %12 : vector<256x256xf32> to vector<256x256xbf16>
      %c0_11 = arith.constant 0 : index
      %c0_12 = arith.constant 0 : index
      %14 = vector.load %arg5[%c0_11, %c0_12] : memref<256x256xbf16, #tpu.memory_space<vmem>>, vector<256x256xbf16>
      tpu.vector_store %arg5[%c0_11, %c0_12], %13 {strides = array<i32>} : memref<256x256xbf16, #tpu.memory_space<vmem>>, vector<256x256xbf16>,
    } else {
    }
    return
  }
  func.func @transform_0(%arg0: i32, %arg1: i32, %arg2: i32) -> (i32, i32) {
    %c0_i32 = arith.constant 0 : i32
    return %arg0, %arg2 : i32, i32
  }
  func.func @transform_1(%arg0: i32, %arg1: i32, %arg2: i32) -> (i32, i32) {
    %c0_i32 = arith.constant 0 : i32
    return %arg2, %arg1 : i32, i32
  }
  func.func @transform_2(%arg0: i32, %arg1: i32, %arg2: i32) -> (i32, i32) {
    %c0_i32 = arith.constant 0 : i32
    return %arg0, %arg1 : i32, i32
  }
}

</mosaic_0001>

<bundles_post_ra>
// kernel: tpu_custom_call.1
= control target key start
LH: loop header
LB: loop body
LE: loop exit
PB: predicated region body
PF: predicated region fallthrough
CT: control target
= control target key end

     0   :  { %s2631_s0 = inlined_call_operand.hbm [shape: bf16[256,512], index: 0, kind: input, shape index: {}]   ;;  %s2632_s1 = inlined_call_operand.hbm [shape: bf16[512,1536], index: 1, kind: input, shape index: {}]   ;;  %s2633_s2 = inlined_call_operand.hbm [shape: bf16[256,1536], index: 2, kind: output, shape index: {}]  }
   0x1   :  { %2643 = sst [smem:[#allocation19_spill]] %s2631_s0 }
   0x2   :  { %2644 = sst [smem:[#allocation20_spill]] %s2633_s2 }
   0x3   :  { %7 = vsyncpa [#allocation4], 0 }
   0x4   :  { %9 = vsyncpa [#allocation4 + $0x1], 0 }
   0x5   :  { %10 = vsyncpa [#allocation7], 0 }
   0x6   :  { %12 = vsyncpa [#allocation7 + $0x1], 0 }
   0x7   :  { %13 = vsyncpa [#allocation5], 0 }
   0x8   :  { %15 = vsyncpa [#allocation5 + $0x1], 0  ;;  %s2157_s9 = smov 0   ;;  %s2159_s10 = smov 0  }
   0x9   :  { %s2161_s11 = smov 0   ;;  %s2163_s12 = smov 0  }
   0xa   :  { %s2165_s13 = smov 0   ;;  %s2167_s14 = smov 0  }
   0xb   :  { %s2169_s15 = smov 0   ;;  %s2171_s16 = smov 0  }
   0xc   :  { %s2173_s17 = smov 0   ;;  %s2175_s18 = smov 0  }
   0xd   :  { %s2177_s19 = smov 0   ;;  %s2179_s20 = smov 0  }
   0xe   :  { %s2181_s21 = smov 0   ;;  %s2183_s22 = smov 0  }
   0xf LB: > { %2645 = sst [smem:[#allocation12_spill]] %s2109_s17  ;;  %s1504_s23 = sadd.s32 4294967295, %s2129_s22   ;;  %s2129_s22 = sphi %s2183_s22, %s21_s22   ;;  %s2125_s21 = sphi %s2181_s21, %s2677_s21   ;;  %s2121_s20 = sphi %s2179_s20, %s2687_s20   ;;  %s2117_s19 = sphi %s2177_s19, %s2675_s19   ;;  %s2113_s18 = sphi %s2175_s18, %s2686_s18   ;;  %s2109_s17 = sphi %s2173_s17, %s2674_s17   ;;  %s2105_s16 = sphi %s2171_s16, %s2685_s16   ;;  %s2101_s15 = sphi %s2169_s15, %s2684_s15   ;;  %s2097_s14 = sphi %s2167_s14, %s2683_s14   ;;  %s2093_s13 = sphi %s2165_s13, %s2682_s13   ;;  %s2089_s12 = sphi %s2163_s12, %s2681_s12   ;;  %s2085_s11 = sphi %s2161_s11, %s2680_s11   ;;  %s2081_s10 = sphi %s2159_s10, %s2679_s10   ;;  %s2077_s9 = sphi %s2157_s9, %s2678_s9  }
  0x10   : > { %2646 = sst [smem:[#allocation13_spill]] %s2117_s19  ;;  %s33_s24 = sadd.s32 1, %s2121_s20 }
  0x11   : > { %2647 = sst [smem:[#allocation14_spill]] %s2125_s21  ;;  %p2227_p0 = scmp.ge.s32.totalorder %s33_s24, 2 }
  0x12   : > { %s49_s26 = sadd.s32 1, %s2109_s17  ;;  %p56_p1 = scmp.ne.s32.totalorder %s2109_s17, %s2105_s16 }
  0x13   : > { %p2637_p2 = scmp.eq.s32.totalorder %s2129_s22, 0  ;;  %s2689_s24 = smov (%p2227_p0, %s33_s24), 0 }
  0x14   : > { %2649 = sst [smem:[#allocation15_spill]] %s2689_s24  ;;  %p62_p4 = scmp.ne.s32.totalorder %s2105_s16, %s2101_s15 }
  0x15   : > { %p2241_p3 = por %p2637_p2, %p56_p1  ;;  %s2248_s28 = ssub.s32 %s2121_s20, %s2689_s24 }
  0x16   : > { %p2250_p5 = scmp.eq.s32.totalorder %s1504_s23, 0  ;;  %p47_p6 = scmp.eq.s32.totalorder %s2248_s28, 0 }
  0x17   : > { %p2255_p7 = scmp.eq.s32.totalorder %s1504_s23, 11  ;;  %p1707_p9 = scmp.lt.s32.totalorder %s2129_s22, 12 }
  0x18   : > { %p2261_p8 = por %p2250_p5, %p62_p4  ;;  %s142_s5 = sand.u32 1, %s2109_s17  }
  0x19   : > { %s2266_s4 = scalar_select %p47_p6, %s2109_s17, %s49_s26  }
  0x1a   : > { %s2653_s3 = scalar_select %p2261_p8, 1, 0 }
  0x1b   : > { %2654 = sst [smem:[#allocation16_spill]] %s2266_s4  ;;  %s1508_s6 = sshll.u32 %s142_s5, 8 }
  0x1c   : > { %s1623_s7 = sshll.u32 %s2121_s20, 7  ;;  %s2655_s0 = sld [smem:[#allocation19_spill]] }
  0x1d   : > { %s146_s2 = scalar_lea.vmem [#allocation3], %s1508_s6  ;;  %p2278_p10 = pnand %p1707_p9, %p2241_p3 }
  0x1e   : > { %s156_s23 = sshll.u32 %s146_s2, 4  ;;  %s143_s26 = scalar_lea.sflag [#allocation4], %s142_s5  ;;  %s157_s23 = int_to_ptr.vmem [resolvable:$true] %s156_s23 }
  0x1f   : > { %p1927_p11 = pneg %p2278_p10  ;;  %s1938_s4 = scalar_lea.vmem %s157_s23, 4096 }
  0x20   : > { %p1939_p12 = scmp.ne.s32.totalorder %s157_s23, %s1938_s4  ;;  %s2131_s17 = smov [#allocation3]  }
  0x21   : > { %s1943_s8 = sshll.u32 %s2131_s17, 4  ;;  %s1944_s8 = int_to_ptr.vmem [resolvable:$false] %s1943_s8 }
  0x22   : > { %s155_s24 = scalar_lea.hbm %s2655_s0, %s1623_s7  ;;  %p1941_p13 = pnand %p1939_p12, %p1927_p11 }
  0x23   : > { %s1945_s6 = scalar_lea.vmem %s1944_s8, 8192  ;;  %p1946_p4 = scmp.lt.s32.totalorder %s157_s23, %s1944_s8 }
  0x24   : > { %p1942_p1 = pneg %p1941_p13  ;;  %p1947_p6 = scmp.lt.s32.totalorder %s1945_s6, %s1938_s4 }
  0x26   : > { %p1948_p2 = por %p1947_p6, %p1946_p4 }
  0x28   : > { %p1949_p8 = pnand %p1948_p2, %p1942_p1 }
  0x2a   : > { %1952 = shalt.err (!%p1949_p8)
}
  0x2b   : > { %s2132_s2 = smov 256   ;;  %s2639_s17 = smov 128  }
  0x2c   : > { %s2640_s27 = smov 8   ;;  %p1516_p2 = scmp.ge.s32.totalorder %s2129_s22, 1 }
  0x2d   : > { %1699 = dma.hbm_to_vmem [thread:$0]  (!%p2278_p10), %s155_s24, 4096, %s157_s23, %s143_s26, %s2132_s2, %s2639_s17, %s2640_s27  }
  0x2e   : > { %p188_p3 = scmp.lt.s32.totalorder %s2129_s22, 13  ;;  %s1505_s5 = sadd.s32 4294967294, %s2129_s22  }
  0x2f   : > { %s36_s7 = sadd.s32 1, %s2125_s21  ;;  %s77_s15 = sadd.s32 1, %s2097_s14 }
  0x30   : > { %p2290_p8 = pnand %p1516_p2, %p188_p3  ;;  %s2691_s7 = smov (!%p2227_p0, %s36_s7), %s2125_s21 }
  0x31   : > { %p84_p11 = scmp.ne.s32.totalorder %s2097_s14, %s2093_s13  ;;  %p90_p10 = scmp.ne.s32.totalorder %s2093_s13, %s2089_s12 }
  0x32   : > { %p38_p12 = scmp.ge.s32.totalorder %s2691_s7, 6  ;;  %s105_s19 = sadd.s32 1, %s2085_s11 }
  0x33   : > { %p2658_p13 = scmp.eq.s32.totalorder %s2129_s22, 0  ;;  %p2313_p4 = por %p90_p10, %p2250_p5 }
  0x34   : > { %s2693_s7 = smov (%p38_p12, %s2691_s7), 0  ;;  %p115_p0 = scmp.ne.s32.totalorder %s2085_s11, %s2081_s10 }
  0x35   : > { %p2307_p1 = por %p84_p11, %p2658_p13  ;;  %2661 = sst [smem:[#allocation17_spill]] %s2693_s7 }
  0x36   : > { %p121_p6 = scmp.ne.s32.totalorder %s2081_s10, %s2077_s9  ;;  %s73_s12 = ssub.s32 %s2125_s21, %s2693_s7 }
  0x37   : > { %p122_p2 = scmp.eq.s32.totalorder %s1505_s5, 11  ;;  %s74_s25 = sor.u32 %s73_s12, %s2248_s28 }
  0x38   : > { %p103_p3 = scmp.eq.s32.totalorder %s73_s12, 0  ;;  %p75_p11 = scmp.eq.s32.totalorder %s74_s25, 0 }
  0x39   : > { %p2328_p13 = por %p2255_p7, %p115_p0  ;;  %p2338_p5 = por %p122_p2, %p121_p6 }
  0x3a   : > { %s2333_s26 = scalar_select %p103_p3, %s2085_s11, %s105_s19  }
  0x3b   : > { %s2336_s8 = scalar_select %p75_p11, %s2097_s14, %s77_s15  }
  0x3c   : > { %s166_s2 = sand.u32 1, %s2097_s14   ;;  %s1513_s27 = sshll.u32 %s2125_s21, 1 }
  0x3d   : > { %2663 = sst [smem:[#allocation18_spill]] %s2336_s8  ;;  %s1511_s17 = sshll.u32 %s166_s2, 8 }
  0x3e   : > { %s1689_s5 = smul.u32 384, %s2121_s20  ;;  %s170_s28 = scalar_lea.vmem [#allocation6], %s1511_s17 }
  0x3f   : > { %s180_s12 = sshll.u32 %s170_s28, 4  ;;  %p2349_p7 = pnand %p1707_p9, %p2307_p1  ;;  %s181_s12 = int_to_ptr.vmem [resolvable:$true] %s180_s12 }
  0x40   : > { %s177_s15 = sadd.s32 %s1689_s5, %s1513_s27  ;;  %s167_s8 = scalar_lea.sflag [#allocation7], %s166_s2 }
  0x41   : > { %s1515_s19 = sshll.u32 %s177_s15, 6  ;;  %p1955_p10 = pneg %p2349_p7 }
  0x42   : > { %s179_s7 = scalar_lea.hbm %s2632_s1, %s1515_s19  ;;  %s1966_s21 = scalar_lea.vmem %s181_s12, 4096 }
  0x43   : > { %p1967_p12 = scmp.ne.s32.totalorder %s181_s12, %s1966_s21  ;;  %s2135_s17 = smov [#allocation6]  }
  0x44   : > { %s1971_s24 = sshll.u32 %s2135_s17, 4  ;;  %s1972_s24 = int_to_ptr.vmem [resolvable:$false] %s1971_s24 }
  0x45   : > { %p1969_p0 = pnand %p1967_p12, %p1955_p10  ;;  %s1973_s28 = scalar_lea.vmem %s1972_s24, 8192 }
  0x46   : > { %p1974_p9 = scmp.lt.s32.totalorder %s181_s12, %s1972_s24  ;;  %p1975_p1 = scmp.lt.s32.totalorder %s1973_s28, %s1966_s21 }
  0x47   : > { %p1970_p6 = pneg %p1969_p0 }
  0x48   : > { %p1976_p2 = por %p1975_p1, %p1974_p9 }
  0x4a   : > { %p1977_p3 = pnand %p1976_p2, %p1970_p6 }
  0x4c   : > { %1980 = shalt.err (!%p1977_p3)
}
  0x4d   : > { %s2136_s27 = smov 768   ;;  %s2666_s0 = smov 8  }
  0x4e   : > { %s2667_s2 = smov 128   ;;  %192 = sbr.rel (%p2290_p8) target bundleno = 504 (0x1f8), region = 28 }
  0x4f   : > { %1702 = dma.hbm_to_vmem [thread:$0]  (!%p2349_p7), %s179_s7, 4096, %s181_s12, %s167_s8, %s2136_s27, %s2667_s2, %s2666_s0  }
  0x50   : > { %s194_s5 = sand.u32 (!%p2290_p8), 1, %s2105_s16   ;;  %p2668_p11 = scmp.ne.s32.totalorder (!%p2290_p8), %s2653_s3, 0 }
  0x51   : > { %s1517_s15 = sshll.u32 (!%p2290_p8), %s194_s5, 8  ;;  %s195_s19 = scalar_lea.sflag (!%p2290_p8), [#allocation4], %s194_s5 }
  0x52   : > { %s2365_s25 = scalar_lea.vmem (!%p2290_p8), [#allocation3], %s1517_s15 }
  0x53   : > { %2064 = dma.done.wait (%p2668_p11), %s195_s19, 4096  }
  0x54   : > { %2066 = vsyncadd (%p2668_p11), %s195_s19, 4294963200  ;;  %s203_s21 = sand.u32 1, %s2093_s13  }
  0x55   : > { %s1518_s30 = sshll.u32 %s203_s21, 8  ;;  %s204_s7 = scalar_lea.sflag [#allocation7], %s203_s21 }
  0x56   : > { %s2372_s8 = scalar_lea.vmem [#allocation6], %s1518_s30 }
  0x57   : > { %2068 = dma.done.wait (%p2313_p4), %s204_s7, 4096  }
  0x58   : > { %2070 = vsyncadd (%p2313_p4), %s204_s7, 4294963200  ;;  %s230_s4 = sand.u32 1, %s2081_s10   ;;  %p1520_p8 = scmp.ne.s32.totalorder %s2113_s18, 0 }
  0x59   : > { %s1519_s12 = sshll.u32 %s230_s4, 8 }
  0x5a   : > { %s2381_s17 = scalar_lea.vmem [#allocation8], %s1519_s12  ;;  %242 = sbr.rel (%p1520_p8) target bundleno = 128 (0x80), region = 40 }
  0x5f   : > { %v2137_v0 = vmov 0.0  }
  0x60   : > { %243 = vst [vmem:[#allocation2 + $0xb0] sm:$0xff] %v2137_v0  ;;  %244 = vst [vmem:[#allocation2 + $0x1b0] sm:$0xff] %v2137_v0 }
  0x61   : > { %245 = vst [vmem:[#allocation2 + $0xd8] sm:$0xff] %v2137_v0  ;;  %246 = vst [vmem:[#allocation2 + $0x18] sm:$0xff] %v2137_v0 }
  0x62   : > { %247 = vst [vmem:[#allocation2 + $0x50] sm:$0xff] %v2137_v0  ;;  %248 = vst [vmem:[#allocation2 + $0x168] sm:$0xff] %v2137_v0 }
  0x63   : > { %249 = vst [vmem:[#allocation2 + $0x130] sm:$0xff] %v2137_v0  ;;  %250 = vst [vmem:[#allocation2 + $0x48] sm:$0xff] %v2137_v0 }
  0x64   : > { %251 = vst [vmem:[#allocation2 + $0x180] sm:$0xff] %v2137_v0  ;;  %252 = vst [vmem:[#allocation2 + $0x110] sm:$0xff] %v2137_v0 }
  0x65   : > { %253 = vst [vmem:[#allocation2 + $0x118] sm:$0xff] %v2137_v0  ;;  %254 = vst [vmem:[#allocation2 + $0x98] sm:$0xff] %v2137_v0 }
  0x66   : > { %255 = vst [vmem:[#allocation2 + $0x120] sm:$0xff] %v2137_v0  ;;  %256 = vst [vmem:[#allocation2 + $0x150] sm:$0xff] %v2137_v0 }
  0x67   : > { %257 = vst [vmem:[#allocation2 + $0x108] sm:$0xff] %v2137_v0  ;;  %258 = vst [vmem:[#allocation2 + $0x60] sm:$0xff] %v2137_v0 }
  0x68   : > { %259 = vst [vmem:[#allocation2 + $0xe0] sm:$0xff] %v2137_v0  ;;  %260 = vst [vmem:[#allocation2 + $0x188] sm:$0xff] %v2137_v0 }
  0x69   : > { %261 = vst [vmem:[#allocation2 + $0x138] sm:$0xff] %v2137_v0  ;;  %262 = vst [vmem:[#allocation2 + $0x140] sm:$0xff] %v2137_v0 }
  0x6a   : > { %263 = vst [vmem:[#allocation2 + $0x80] sm:$0xff] %v2137_v0  ;;  %264 = vst [vmem:[#allocation2 + $0x1a8] sm:$0xff] %v2137_v0 }
  0x6b   : > { %265 = vst [vmem:[#allocation2 + $0x1b8] sm:$0xff] %v2137_v0  ;;  %266 = vst [vmem:[#allocation2 + $0x28] sm:$0xff] %v2137_v0 }
  0x6c   : > { %267 = vst [vmem:[#allocation2 + $0x1e8] sm:$0xff] %v2137_v0  ;;  %268 = vst [vmem:[#allocation2 + $0xf8] sm:$0xff] %v2137_v0 }
  0x6d   : > { %269 = vst [vmem:[#allocation2 + $0x160] sm:$0xff] %v2137_v0  ;;  %270 = vst [vmem:[#allocation2 + $0x30] sm:$0xff] %v2137_v0 }
  0x6e   : > { %271 = vst [vmem:[#allocation2 + $0x1e0] sm:$0xff] %v2137_v0  ;;  %272 = vst [vmem:[#allocation2] sm:$0xff] %v2137_v0 }
  0x6f   : > { %273 = vst [vmem:[#allocation2 + $0xf0] sm:$0xff] %v2137_v0  ;;  %274 = vst [vmem:[#allocation2 + $0x8] sm:$0xff] %v2137_v0 }
  0x70   : > { %275 = vst [vmem:[#allocation2 + $0x148] sm:$0xff] %v2137_v0  ;;  %276 = vst [vmem:[#allocation2 + $0x1d0] sm:$0xff] %v2137_v0 }
  0x71   : > { %277 = vst [vmem:[#allocation2 + $0x100] sm:$0xff] %v2137_v0  ;;  %278 = vst [vmem:[#allocation2 + $0xc8] sm:$0xff] %v2137_v0 }
  0x72   : > { %279 = vst [vmem:[#allocation2 + $0x40] sm:$0xff] %v2137_v0  ;;  %280 = vst [vmem:[#allocation2 + $0x1f8] sm:$0xff] %v2137_v0 }
  0x73   : > { %281 = vst [vmem:[#allocation2 + $0x20] sm:$0xff] %v2137_v0  ;;  %282 = vst [vmem:[#allocation2 + $0x128] sm:$0xff] %v2137_v0 }
  0x74   : > { %283 = vst [vmem:[#allocation2 + $0x1a0] sm:$0xff] %v2137_v0  ;;  %284 = vst [vmem:[#allocation2 + $0x1f0] sm:$0xff] %v2137_v0 }
  0x75   : > { %285 = vst [vmem:[#allocation2 + $0xe8] sm:$0xff] %v2137_v0  ;;  %286 = vst [vmem:[#allocation2 + $0x78] sm:$0xff] %v2137_v0 }
  0x76   : > { %287 = vst [vmem:[#allocation2 + $0x70] sm:$0xff] %v2137_v0  ;;  %288 = vst [vmem:[#allocation2 + $0x90] sm:$0xff] %v2137_v0 }
  0x77   : > { %289 = vst [vmem:[#allocation2 + $0x1d8] sm:$0xff] %v2137_v0  ;;  %290 = vst [vmem:[#allocation2 + $0xd0] sm:$0xff] %v2137_v0 }
  0x78   : > { %291 = vst [vmem:[#allocation2 + $0xb8] sm:$0xff] %v2137_v0  ;;  %292 = vst [vmem:[#allocation2 + $0x88] sm:$0xff] %v2137_v0 }
  0x79   : > { %293 = vst [vmem:[#allocation2 + $0xa8] sm:$0xff] %v2137_v0  ;;  %294 = vst [vmem:[#allocation2 + $0x1c8] sm:$0xff] %v2137_v0 }
  0x7a   : > { %295 = vst [vmem:[#allocation2 + $0x170] sm:$0xff] %v2137_v0  ;;  %296 = vst [vmem:[#allocation2 + $0x178] sm:$0xff] %v2137_v0 }
  0x7b   : > { %297 = vst [vmem:[#allocation2 + $0x68] sm:$0xff] %v2137_v0  ;;  %298 = vst [vmem:[#allocation2 + $0x190] sm:$0xff] %v2137_v0 }
  0x7c   : > { %299 = vst [vmem:[#allocation2 + $0x198] sm:$0xff] %v2137_v0  ;;  %300 = vst [vmem:[#allocation2 + $0x38] sm:$0xff] %v2137_v0 }
  0x7d   : > { %301 = vst [vmem:[#allocation2 + $0xc0] sm:$0xff] %v2137_v0  ;;  %302 = vst [vmem:[#allocation2 + $0x1c0] sm:$0xff] %v2137_v0 }
  0x7e   : > { %303 = vst [vmem:[#allocation2 + $0x158] sm:$0xff] %v2137_v0  ;;  %304 = vst [vmem:[#allocation2 + $0x10] sm:$0xff] %v2137_v0 }
  0x7f   : > { %305 = vst [vmem:[#allocation2 + $0x58] sm:$0xff] %v2137_v0  ;;  %306 = vst [vmem:[#allocation2 + $0xa0] sm:$0xff] %v2137_v0 }
  0x80 PF: > { %v1829_v1 = vld [vmem:[%s2372_s8 + $0x74] ss:$8 sps:$4 sm:$0xff]   ;;  %v1831_v2 = vld [vmem:[%s2372_s8 + $0x70] ss:$8 sps:$4 sm:$0xff]   ;;  %v1832_v3 = vld [vmem:[%s2372_s8 + $0x64] ss:$8 sps:$4 sm:$0xff]  }
  0x81   : > { %755 = vmatprep.subr.bf16.mxu0 %v1829_v1  ;;  %1657 = vmatprep.subr.bf16.mxu1 %v1829_v1  ;;  %v1834_v4 = vld [vmem:[%s2372_s8 + $0x60] ss:$8 sps:$4 sm:$0xff]   ;;  %v1835_v5 = vld [vmem:[%s2372_s8 + $0x54] ss:$8 sps:$4 sm:$0xff]   ;;  %v1837_v6 = vld [vmem:[%s2372_s8 + $0x50] ss:$8 sps:$4 sm:$0xff]  }
  0x82   : > { %756 = vmatpush1.bf16.msra.mxu0 %v1831_v2  ;;  %1673 = vmatpush1.bf16.msra.mxu1 %v1831_v2  ;;  %v1838_v7 = vld [vmem:[%s2372_s8 + $0x44] ss:$8 sps:$4 sm:$0xff]   ;;  %v1840_v8 = vld [vmem:[%s2372_s8 + $0x40] ss:$8 sps:$4 sm:$0xff]   ;;  %v1841_v9 = vld [vmem:[%s2372_s8 + $0x34] ss:$8 sps:$4 sm:$0xff]  }
  0x83   : > { %757 = vmatprep.subr.bf16.mxu0 %v1832_v3  ;;  %1658 = vmatprep.subr.bf16.mxu1 %v1832_v3  ;;  %v1843_v10 = vld [vmem:[%s2372_s8 + $0x30] ss:$8 sps:$4 sm:$0xff]   ;;  %v1844_v11 = vld [vmem:[%s2372_s8 + $0x24] ss:$8 sps:$4 sm:$0xff]   ;;  %v1846_v12 = vld [vmem:[%s2372_s8 + $0x20] ss:$8 sps:$4 sm:$0xff]  }
  0x84   : > { %v1847_v13 = vld [vmem:[%s2372_s8 + $0x14] ss:$8 sps:$4 sm:$0xff]   ;;  %v1879_v14 = vld [vmem:[%s2365_s25 + $0x4] ss:$8 sps:$4 sm:$0xff]   ;;  %v1849_v15 = vld [vmem:[%s2372_s8 + $0x10] ss:$8 sps:$4 sm:$0xff]  }
  0x85   : > { %v1882_v16 = vld [vmem:[%s2365_s25 + $0x84] ss:$8 sps:$4 sm:$0xff]   ;;  %787 = vmatprep.mubr.bf16.mxu0 %v1879_v14  ;;  %v1852_v18 = vld [vmem:[%s2372_s8] ss:$8 sps:$4 sm:$0xff]   ;;  %v1853_v19 = vld [vmem:[%s2372_s8 + $0xf4] ss:$8 sps:$4 sm:$0xff]  }
  0x86   : > { %758 = vmatpush1.bf16.msra.mxu0 %v1834_v4  ;;  %1674 = vmatpush1.bf16.msra.mxu1 %v1834_v4  ;;  %v1850_v17 = vld [vmem:[%s2372_s8 + $0x4] ss:$8 sps:$4 sm:$0xff]   ;;  %v1855_v20 = vld [vmem:[%s2372_s8 + $0xf0] ss:$8 sps:$4 sm:$0xff]   ;;  %v1858_v22 = vld [vmem:[%s2372_s8 + $0xe0] ss:$8 sps:$4 sm:$0xff]  }
  0x87   : > { %759 = vmatprep.subr.bf16.mxu0 %v1835_v5  ;;  %1659 = vmatprep.subr.bf16.mxu1 %v1835_v5  ;;  %v1856_v21 = vld [vmem:[%s2372_s8 + $0xe4] ss:$8 sps:$4 sm:$0xff]   ;;  %v1859_v23 = vld [vmem:[%s2372_s8 + $0xd4] ss:$8 sps:$4 sm:$0xff]   ;;  %v1861_v24 = vld [vmem:[%s2372_s8 + $0xd0] ss:$8 sps:$4 sm:$0xff]  }
  0x88   : > { %867 = vmatprep.mubr.bf16.mxu1 %v1882_v16  ;;  %v1862_v25 = vld [vmem:[%s2372_s8 + $0xc4] ss:$8 sps:$4 sm:$0xff]   ;;  %v1864_v26 = vld [vmem:[%s2372_s8 + $0xc0] ss:$8 sps:$4 sm:$0xff]   ;;  %v1865_v27 = vld [vmem:[%s2372_s8 + $0xb4] ss:$8 sps:$4 sm:$0xff]  }
  0x89   : > { %v1867_v28 = vld [vmem:[%s2372_s8 + $0xb0] ss:$8 sps:$4 sm:$0xff]   ;;  %v1868_v29 = vld [vmem:[%s2372_s8 + $0xa4] ss:$8 sps:$4 sm:$0xff]   ;;  %v1870_v30 = vld [vmem:[%s2372_s8 + $0xa0] ss:$8 sps:$4 sm:$0xff]  }
  0x8a   : > { %760 = vmatpush1.bf16.msra.mxu0 %v1837_v6  ;;  %1675 = vmatpush1.bf16.msra.mxu1 %v1837_v6  ;;  %v1871_v31 = vld [vmem:[%s2372_s8 + $0x94] ss:$8 sps:$4 sm:$0xff]   ;;  %v1873_v32 = vld [vmem:[%s2372_s8 + $0x90] ss:$8 sps:$4 sm:$0xff]   ;;  %v1874_v33 = vld [vmem:[%s2372_s8 + $0x84] ss:$8 sps:$4 sm:$0xff]  }
  0x8b   : > { %761 = vmatprep.subr.bf16.mxu0 %v1838_v7  ;;  %1660 = vmatprep.subr.bf16.mxu1 %v1838_v7  ;;  %v1876_v34 = vld [vmem:[%s2372_s8 + $0x80] ss:$8 sps:$4 sm:$0xff]   ;;  %v1883_v37 = vld [vmem:[%s2365_s25 + $0x14] ss:$8 sps:$4 sm:$0xff]   ;;  %v1887_v39 = vld [vmem:[%s2365_s25 + $0x10] ss:$8 sps:$4 sm:$0xff]  }
  0x8c   : > { %v1877_v35 = vld [vmem:[%s2365_s25] ss:$8 sps:$4 sm:$0xff]   ;;  %v1885_v38 = vld [vmem:[%s2365_s25 + $0x94] ss:$8 sps:$4 sm:$0xff]   ;;  %v1888_v40 = vld [vmem:[%s2365_s25 + $0x90] ss:$8 sps:$4 sm:$0xff]  }
  0x8d   : > { %v1880_v36 = vld [vmem:[%s2365_s25 + $0x80] ss:$8 sps:$4 sm:$0xff]   ;;  %v1889_v41 = vld [vmem:[%s2365_s25 + $0x24] ss:$8 sps:$4 sm:$0xff]   ;;  %v1895_v45 = vld [vmem:[%s2365_s25 + $0x34] ss:$8 sps:$4 sm:$0xff]  }
  0x8e   : > { %762 = vmatpush1.bf16.msra.mxu0 %v1840_v8  ;;  %1676 = vmatpush1.bf16.msra.mxu1 %v1840_v8  ;;  %v1891_v42 = vld [vmem:[%s2365_s25 + $0xa4] ss:$8 sps:$4 sm:$0xff]   ;;  %v1893_v43 = vld [vmem:[%s2365_s25 + $0x20] ss:$8 sps:$4 sm:$0xff]   ;;  %v1897_v46 = vld [vmem:[%s2365_s25 + $0xb4] ss:$8 sps:$4 sm:$0xff]  }
  0x8f   : > { %763 = vmatprep.subr.bf16.mxu0 %v1841_v9  ;;  %1661 = vmatprep.subr.bf16.mxu1 %v1841_v9  ;;  %v1894_v44 = vld [vmem:[%s2365_s25 + $0xa0] ss:$8 sps:$4 sm:$0xff]   ;;  %v1899_v47 = vld [vmem:[%s2365_s25 + $0x30] ss:$8 sps:$4 sm:$0xff]   ;;  %v1901_v49 = vld [vmem:[%s2365_s25 + $0x44] ss:$8 sps:$4 sm:$0xff]  }
  0x90   : > { %v1900_v48 = vld [vmem:[%s2365_s25 + $0xb0] ss:$8 sps:$4 sm:$0xff]   ;;  %v1903_v50 = vld [vmem:[%s2365_s25 + $0xc4] ss:$8 sps:$4 sm:$0xff]   ;;  %v1905_v51 = vld [vmem:[%s2365_s25 + $0x40] ss:$8 sps:$4 sm:$0xff]  }
  0x91   : > { %v1906_v52 = vld [vmem:[%s2365_s25 + $0xc0] ss:$8 sps:$4 sm:$0xff]   ;;  %v1907_v53 = vld [vmem:[%s2365_s25 + $0x54] ss:$8 sps:$4 sm:$0xff]   ;;  %v1911_v55 = vld [vmem:[%s2365_s25 + $0x50] ss:$8 sps:$4 sm:$0xff]  }
  0x92   : > { %764 = vmatpush1.bf16.msra.mxu0 %v1843_v10  ;;  %1677 = vmatpush1.bf16.msra.mxu1 %v1843_v10  ;;  %v1909_v54 = vld [vmem:[%s2365_s25 + $0xd4] ss:$8 sps:$4 sm:$0xff]   ;;  %v1912_v56 = vld [vmem:[%s2365_s25 + $0xd0] ss:$8 sps:$4 sm:$0xff]   ;;  %v1913_v57 = vld [vmem:[%s2365_s25 + $0x64] ss:$8 sps:$4 sm:$0xff]  }
  0x93   : > { %765 = vmatprep.subr.bf16.mxu0 %v1844_v11  ;;  %1662 = vmatprep.subr.bf16.mxu1 %v1844_v11  ;;  %v1915_v58 = vld [vmem:[%s2365_s25 + $0xe4] ss:$8 sps:$4 sm:$0xff]   ;;  %v1917_v59 = vld [vmem:[%s2365_s25 + $0x60] ss:$8 sps:$4 sm:$0xff]   ;;  %v1919_v61 = vld [vmem:[%s2365_s25 + $0x74] ss:$8 sps:$4 sm:$0xff]  }
  0x94   : > { %v1918_v60 = vld [vmem:[%s2365_s25 + $0xe0] ss:$8 sps:$4 sm:$0xff]   ;;  %v1921_v62 = vld [vmem:[%s2365_s25 + $0xf4] ss:$8 sps:$4 sm:$0xff]   ;;  %v1923_v63 = vld [vmem:[%s2365_s25 + $0x70] ss:$8 sps:$4 sm:$0xff]  }
  0x95   : > { %v1924_v0 = vld [vmem:[%s2365_s25 + $0xf0] ss:$8 sps:$4 sm:$0xff]   ;;  %v339_v2 = vld [vmem:[#allocation2 + $0x148] sm:$0xff]  ;;  %p1585_p4 = scmp.ne.s32.totalorder %s2113_s18, 1 }
  0x96   : > { %766 = vmatpush1.bf16.msra.mxu0 %v1846_v12  ;;  %1678 = vmatpush1.bf16.msra.mxu1 %v1846_v12  ;;  %v307_v1 = vld [vmem:[#allocation2 + $0xb0] sm:$0xff]  ;;  %v309_v11 = vld [vmem:[#allocation2 + $0xd8] sm:$0xff]  ;;  %v341_v12 = vld [vmem:[#allocation2 + $0x100] sm:$0xff] }
  0x97   : > { %767 = vmatprep.subr.bf16.mxu0 %v1847_v13  ;;  %1663 = vmatprep.subr.bf16.mxu1 %v1847_v13  ;;  %v308_v5 = vld [vmem:[#allocation2 + $0x1b0] sm:$0xff] }
  0x98   : > { %v340_v6 = vld [vmem:[#allocation2 + $0x1d0] sm:$0xff] }
  0x9a   : > { %768 = vmatpush1.bf16.msra.mxu0 %v1849_v15  ;;  %1679 = vmatpush1.bf16.msra.mxu1 %v1849_v15 }
  0x9b   : > { %769 = vmatprep.subr.bf16.mxu0 %v1850_v17  ;;  %1664 = vmatprep.subr.bf16.mxu1 %v1850_v17  ;;  %v310_v17 = vld [vmem:[#allocation2 + $0x18] sm:$0xff] }
  0x9e   : > { %770 = vmatpush1.bf16.msra.mxu0 %v1852_v18  ;;  %1680 = vmatpush1.bf16.msra.mxu1 %v1852_v18  ;;  %v342_v18 = vld [vmem:[#allocation2 + $0xc8] sm:$0xff] }
  0x9f   : > { %771 = vmatprep.subr.bf16.mxu0 %v1853_v19  ;;  %1665 = vmatprep.subr.bf16.mxu1 %v1853_v19 }
  0xa2   : > { %772 = vmatpush2.bf16.msra.mxu0 %v1855_v20  ;;  %1681 = vmatpush2.bf16.msra.mxu1 %v1855_v20 }
  0xa3   : > { %773 = vmatprep.subr.bf16.mxu0 %v1856_v21  ;;  %1666 = vmatprep.subr.bf16.mxu1 %v1856_v21 }
  0xa6   : > { %774 = vmatpush2.bf16.msra.mxu0 %v1858_v22  ;;  %1682 = vmatpush2.bf16.msra.mxu1 %v1858_v22 }
  0xa7   : > { %775 = vmatprep.subr.bf16.mxu0 %v1859_v23  ;;  %1667 = vmatprep.subr.bf16.mxu1 %v1859_v23  ;;  %v311_v23 = vld [vmem:[#allocation2 + $0x50] sm:$0xff] }
  0xaa   : > { %776 = vmatpush2.bf16.msra.mxu0 %v1861_v24  ;;  %1683 = vmatpush2.bf16.msra.mxu1 %v1861_v24  ;;  %v343_v24 = vld [vmem:[#allocation2 + $0x40] sm:$0xff] }
  0xab   : > { %777 = vmatprep.subr.bf16.mxu0 %v1862_v25  ;;  %1668 = vmatprep.subr.bf16.mxu1 %v1862_v25 }
  0xae   : > { %778 = vmatpush2.bf16.msra.mxu0 %v1864_v26  ;;  %1684 = vmatpush2.bf16.msra.mxu1 %v1864_v26 }
  0xaf   : > { %779 = vmatprep.subr.bf16.mxu0 %v1865_v27  ;;  %1669 = vmatprep.subr.bf16.mxu1 %v1865_v27 }
  0xb2   : > { %780 = vmatpush2.bf16.msra.mxu0 %v1867_v28  ;;  %1685 = vmatpush2.bf16.msra.mxu1 %v1867_v28 }
  0xb3   : > { %781 = vmatprep.subr.bf16.mxu0 %v1868_v29  ;;  %1670 = vmatprep.subr.bf16.mxu1 %v1868_v29  ;;  %v312_v29 = vld [vmem:[#allocation2 + $0x168] sm:$0xff] }
  0xb6   : > { %782 = vmatpush2.bf16.msra.mxu0 %v1870_v30  ;;  %1686 = vmatpush2.bf16.msra.mxu1 %v1870_v30  ;;  %v344_v30 = vld [vmem:[#allocation2 + $0x1f8] sm:$0xff] }
  0xb7   : > { %783 = vmatprep.subr.bf16.mxu0 %v1871_v31  ;;  %1671 = vmatprep.subr.bf16.mxu1 %v1871_v31 }
  0xba   : > { %784 = vmatpush2.bf16.msra.mxu0 %v1873_v32  ;;  %1687 = vmatpush2.bf16.msra.mxu1 %v1873_v32 }
  0xbb   : > { %785 = vmatprep.subr.bf16.mxu0 %v1874_v33  ;;  %1672 = vmatprep.subr.bf16.mxu1 %v1874_v33 }
  0xbe   : > { %786 = vmatpush2.bf16.msra.mxu0 %v1876_v34  ;;  %1688 = vmatpush2.bf16.msra.mxu1 %v1876_v34 }
  0xc1   : > { %788 = vmatmul.mubr.bf16.vlgmr.msra.gmra.mxu0 %v1877_v35  ;;  %868 = vmatmul.mubr.bf16.vlgmr.msra.gmra.mxu1 %v1880_v36  ;;  %v313_v35 = vld [vmem:[#allocation2 + $0x130] sm:$0xff]  ;;  %v345_v36 = vld [vmem:[#allocation2 + $0x20] sm:$0xff] }
  0xc2   : > { %797 = vmatprep.mubr.bf16.mxu0 %v1883_v37  ;;  %877 = vmatprep.mubr.bf16.mxu1 %v1885_v38 }
  0xc9   : > { %798 = vmatmul.mubr.bf16.gmra.mxu0 %v1887_v39  ;;  %878 = vmatmul.mubr.bf16.gmra.mxu1 %v1888_v40 }
  0xca   : > { %807 = vmatprep.mubr.bf16.mxu0 %v1889_v41  ;;  %887 = vmatprep.mubr.bf16.mxu1 %v1891_v42  ;;  %v314_v41 = vld [vmem:[#allocation2 + $0x48] sm:$0xff] }
  0xcb   : > { %v346_v42 = vld [vmem:[#allocation2 + $0x128] sm:$0xff] }
  0xd1   : > { %808 = vmatmul.mubr.bf16.gmra.mxu0 %v1893_v43  ;;  %888 = vmatmul.mubr.bf16.gmra.mxu1 %v1894_v44 }
  0xd2   : > { %817 = vmatprep.mubr.bf16.mxu0 %v1895_v45  ;;  %897 = vmatprep.mubr.bf16.mxu1 %v1897_v46 }
  0xd9   : > { %818 = vmatmul.mubr.bf16.gmra.mxu0 %v1899_v47  ;;  %898 = vmatmul.mubr.bf16.gmra.mxu1 %v1900_v48  ;;  %v315_v47 = vld [vmem:[#allocation2 + $0x180] sm:$0xff] }
  0xda   : > { %827 = vmatprep.mubr.bf16.mxu0 %v1901_v49  ;;  %907 = vmatprep.mubr.bf16.mxu1 %v1903_v50  ;;  %v347_v48 = vld [vmem:[#allocation2 + $0x1a0] sm:$0xff] }
  0xe1   : > { %828 = vmatmul.mubr.bf16.gmra.mxu0 %v1905_v51  ;;  %908 = vmatmul.mubr.bf16.gmra.mxu1 %v1906_v52 }
  0xe2   : > { %837 = vmatprep.mubr.bf16.mxu0 %v1907_v53  ;;  %917 = vmatprep.mubr.bf16.mxu1 %v1909_v54  ;;  %v316_v53 = vld [vmem:[#allocation2 + $0x110] sm:$0xff] }
  0xe3   : > { %v348_v54 = vld [vmem:[#allocation2 + $0x1f0] sm:$0xff] }
  0xe9   : > { %838 = vmatmul.mubr.bf16.gmra.mxu0 %v1911_v55  ;;  %918 = vmatmul.mubr.bf16.gmra.mxu1 %v1912_v56 }
  0xea   : > { %847 = vmatprep.mubr.bf16.mxu0 %v1913_v57  ;;  %927 = vmatprep.mubr.bf16.mxu1 %v1915_v58 }
  0xf1   : > { %848 = vmatmul.mubr.bf16.gmra.mxu0 %v1917_v59  ;;  %928 = vmatmul.mubr.bf16.gmra.mxu1 %v1918_v60  ;;  %v317_v59 = vld [vmem:[#allocation2 + $0x118] sm:$0xff]  ;;  %v349_v60 = vld [vmem:[#allocation2 + $0xe8] sm:$0xff] }
  0xf2   : > { %857 = vmatprep.mubr.bf16.mxu0 %v1919_v61  ;;  %937 = vmatprep.mubr.bf16.mxu1 %v1921_v62 }
  0xf9   : > { %858 = vmatmul.mubr.bf16.gmra.mxu0 %v1923_v63  ;;  %938 = vmatmul.mubr.bf16.gmra.mxu1 %v1924_v0 }
 0x181   : > { %v789_v3 = vpop.f32.mrf.mxu0  ;;  %v869_v4 = vpop.f32.mrf.mxu1 }
 0x182   : > { %v948_v7 = vadd.f32 %v789_v3, %v307_v1  ;;  %v980_v8 = vadd.f32 %v869_v4, %v339_v2  ;;  %v318_v1 = vld [vmem:[#allocation2 + $0x98] sm:$0xff] }
 0x183   : > { %v791_v9 = vpop.f32.mrf.mxu0  ;;  %v871_v10 = vpop.f32.mrf.mxu1  ;;  %v350_v2 = vld [vmem:[#allocation2 + $0x78] sm:$0xff] }
 0x184   : > { %1012 = vst [vmem:[#allocation2 + $0xb0] sm:$0xff] %v948_v7  ;;  %1044 = vst [vmem:[#allocation2 + $0x148] sm:$0xff] %v980_v8  ;;  %v949_v13 = vadd.f32 %v791_v9, %v308_v5  ;;  %v981_v14 = vadd.f32 %v871_v10, %v340_v6  ;;  %v319_v7 = vld [vmem:[#allocation2 + $0x120] sm:$0xff]  ;;  %v351_v8 = vld [vmem:[#allocation2 + $0x70] sm:$0xff] }
 0x185   : > { %v793_v15 = vpop.f32.mrf.mxu0  ;;  %v873_v16 = vpop.f32.mrf.mxu1 }
 0x186   : > { %1013 = vst [vmem:[#allocation2 + $0x1b0] sm:$0xff] %v949_v13  ;;  %1045 = vst [vmem:[#allocation2 + $0x1d0] sm:$0xff] %v981_v14  ;;  %v950_v19 = vadd.f32 %v793_v15, %v309_v11  ;;  %v982_v20 = vadd.f32 %v873_v16, %v341_v12  ;;  %v320_v13 = vld [vmem:[#allocation2 + $0x150] sm:$0xff] }
 0x187   : > { %v795_v21 = vpop.f32.mrf.mxu0  ;;  %v875_v22 = vpop.f32.mrf.mxu1  ;;  %v352_v14 = vld [vmem:[#allocation2 + $0x90] sm:$0xff] }
 0x188   : > { %1014 = vst [vmem:[#allocation2 + $0xd8] sm:$0xff] %v950_v19  ;;  %1046 = vst [vmem:[#allocation2 + $0x100] sm:$0xff] %v982_v20  ;;  %v951_v25 = vadd.f32 %v795_v21, %v310_v17  ;;  %v983_v26 = vadd.f32 %v875_v22, %v342_v18  ;;  %v321_v19 = vld [vmem:[#allocation2 + $0x108] sm:$0xff]  ;;  %v353_v20 = vld [vmem:[#allocation2 + $0x1d8] sm:$0xff] }
 0x189   : > { %v799_v27 = vpop.f32.mrf.mxu0  ;;  %v879_v28 = vpop.f32.mrf.mxu1 }
 0x18a   : > { %1015 = vst [vmem:[#allocation2 + $0x18] sm:$0xff] %v951_v25  ;;  %1047 = vst [vmem:[#allocation2 + $0xc8] sm:$0xff] %v983_v26  ;;  %v952_v31 = vadd.f32 %v799_v27, %v311_v23  ;;  %v984_v32 = vadd.f32 %v879_v28, %v343_v24  ;;  %v322_v25 = vld [vmem:[#allocation2 + $0x60] sm:$0xff]  ;;  %v354_v26 = vld [vmem:[#allocation2 + $0xd0] sm:$0xff] }
 0x18b   : > { %v801_v33 = vpop.f32.mrf.mxu0  ;;  %v881_v34 = vpop.f32.mrf.mxu1 }
 0x18c   : > { %1016 = vst [vmem:[#allocation2 + $0x50] sm:$0xff] %v952_v31  ;;  %1048 = vst [vmem:[#allocation2 + $0x40] sm:$0xff] %v984_v32  ;;  %v953_v37 = vadd.f32 %v801_v33, %v312_v29  ;;  %v985_v38 = vadd.f32 %v881_v34, %v344_v30  ;;  %v323_v31 = vld [vmem:[#allocation2 + $0xe0] sm:$0xff]  ;;  %v355_v32 = vld [vmem:[#allocation2 + $0xb8] sm:$0xff] }
 0x18d   : > { %v803_v39 = vpop.f32.mrf.mxu0  ;;  %v883_v40 = vpop.f32.mrf.mxu1 }
 0x18e   : > { %1017 = vst [vmem:[#allocation2 + $0x168] sm:$0xff] %v953_v37  ;;  %1049 = vst [vmem:[#allocation2 + $0x1f8] sm:$0xff] %v985_v38  ;;  %v954_v43 = vadd.f32 %v803_v39, %v313_v35  ;;  %v986_v44 = vadd.f32 %v883_v40, %v345_v36  ;;  %v324_v37 = vld [vmem:[#allocation2 + $0x188] sm:$0xff] }
 0x18f   : > { %v805_v45 = vpop.f32.mrf.mxu0  ;;  %v885_v46 = vpop.f32.mrf.mxu1  ;;  %v356_v38 = vld [vmem:[#allocation2 + $0x88] sm:$0xff] }
 0x190   : > { %1018 = vst [vmem:[#allocation2 + $0x130] sm:$0xff] %v954_v43  ;;  %1050 = vst [vmem:[#allocation2 + $0x20] sm:$0xff] %v986_v44  ;;  %v955_v49 = vadd.f32 %v805_v45, %v314_v41  ;;  %v987_v50 = vadd.f32 %v885_v46, %v346_v42  ;;  %v325_v43 = vld [vmem:[#allocation2 + $0x138] sm:$0xff]  ;;  %v357_v44 = vld [vmem:[#allocation2 + $0xa8] sm:$0xff] }
 0x191   : > { %v809_v51 = vpop.f32.mrf.mxu0  ;;  %v889_v52 = vpop.f32.mrf.mxu1 }
 0x192   : > { %1019 = vst [vmem:[#allocation2 + $0x48] sm:$0xff] %v955_v49  ;;  %1051 = vst [vmem:[#allocation2 + $0x128] sm:$0xff] %v987_v50  ;;  %v956_v55 = vadd.f32 %v809_v51, %v315_v47  ;;  %v988_v56 = vadd.f32 %v889_v52, %v347_v48  ;;  %v326_v49 = vld [vmem:[#allocation2 + $0x140] sm:$0xff]  ;;  %v358_v50 = vld [vmem:[#allocation2 + $0x1c8] sm:$0xff] }
 0x193   : > { %v811_v57 = vpop.f32.mrf.mxu0  ;;  %v891_v58 = vpop.f32.mrf.mxu1 }
 0x194   : > { %1020 = vst [vmem:[#allocation2 + $0x180] sm:$0xff] %v956_v55  ;;  %1052 = vst [vmem:[#allocation2 + $0x1a0] sm:$0xff] %v988_v56  ;;  %v957_v61 = vadd.f32 %v811_v57, %v316_v53  ;;  %v989_v62 = vadd.f32 %v891_v58, %v348_v54  ;;  %v327_v55 = vld [vmem:[#allocation2 + $0x80] sm:$0xff]  ;;  %v359_v56 = vld [vmem:[#allocation2 + $0x170] sm:$0xff] }
 0x195   : > { %v813_v63 = vpop.f32.mrf.mxu0  ;;  %v893_v0 = vpop.f32.mrf.mxu1 }
 0x196   : > { %1021 = vst [vmem:[#allocation2 + $0x110] sm:$0xff] %v957_v61  ;;  %1053 = vst [vmem:[#allocation2 + $0x1f0] sm:$0xff] %v989_v62  ;;  %v958_v3 = vadd.f32 %v813_v63, %v317_v59  ;;  %v990_v4 = vadd.f32 %v893_v0, %v349_v60  ;;  %v328_v61 = vld [vmem:[#allocation2 + $0x1a8] sm:$0xff]  ;;  %v360_v62 = vld [vmem:[#allocation2 + $0x178] sm:$0xff] }
 0x197   : > { %v815_v5 = vpop.f32.mrf.mxu0  ;;  %v895_v6 = vpop.f32.mrf.mxu1 }
 0x198   : > { %1022 = vst [vmem:[#allocation2 + $0x118] sm:$0xff] %v958_v3  ;;  %1054 = vst [vmem:[#allocation2 + $0xe8] sm:$0xff] %v990_v4  ;;  %v959_v9 = vadd.f32 %v815_v5, %v318_v1  ;;  %v991_v10 = vadd.f32 %v895_v6, %v350_v2  ;;  %v329_v3 = vld [vmem:[#allocation2 + $0x1b8] sm:$0xff]  ;;  %v361_v4 = vld [vmem:[#allocation2 + $0x68] sm:$0xff] }
 0x199   : > { %v819_v11 = vpop.f32.mrf.mxu0  ;;  %v899_v12 = vpop.f32.mrf.mxu1 }
 0x19a   : > { %1023 = vst [vmem:[#allocation2 + $0x98] sm:$0xff] %v959_v9  ;;  %1055 = vst [vmem:[#allocation2 + $0x78] sm:$0xff] %v991_v10  ;;  %v960_v15 = vadd.f32 %v819_v11, %v319_v7  ;;  %v992_v16 = vadd.f32 %v899_v12, %v351_v8  ;;  %v330_v9 = vld [vmem:[#allocation2 + $0x28] sm:$0xff]  ;;  %v362_v10 = vld [vmem:[#allocation2 + $0x190] sm:$0xff] }
 0x19b   : > { %v821_v17 = vpop.f32.mrf.mxu0  ;;  %v901_v18 = vpop.f32.mrf.mxu1 }
 0x19c   : > { %1024 = vst [vmem:[#allocation2 + $0x120] sm:$0xff] %v960_v15  ;;  %1056 = vst [vmem:[#allocation2 + $0x70] sm:$0xff] %v992_v16  ;;  %v961_v21 = vadd.f32 %v821_v17, %v320_v13  ;;  %v993_v22 = vadd.f32 %v901_v18, %v352_v14  ;;  %v331_v15 = vld [vmem:[#allocation2 + $0x1e8] sm:$0xff]  ;;  %v363_v16 = vld [vmem:[#allocation2 + $0x198] sm:$0xff] }
 0x19d   : > { %v823_v23 = vpop.f32.mrf.mxu0  ;;  %v903_v24 = vpop.f32.mrf.mxu1 }
 0x19e   : > { %1025 = vst [vmem:[#allocation2 + $0x150] sm:$0xff] %v961_v21  ;;  %1057 = vst [vmem:[#allocation2 + $0x90] sm:$0xff] %v993_v22  ;;  %v962_v27 = vadd.f32 %v823_v23, %v321_v19  ;;  %v994_v28 = vadd.f32 %v903_v24, %v353_v20  ;;  %v332_v21 = vld [vmem:[#allocation2 + $0xf8] sm:$0xff] }
 0x19f   : > { %v825_v29 = vpop.f32.mrf.mxu0  ;;  %v905_v30 = vpop.f32.mrf.mxu1  ;;  %v364_v22 = vld [vmem:[#allocation2 + $0x38] sm:$0xff] }
 0x1a0   : > { %1026 = vst [vmem:[#allocation2 + $0x108] sm:$0xff] %v962_v27  ;;  %1058 = vst [vmem:[#allocation2 + $0x1d8] sm:$0xff] %v994_v28  ;;  %v963_v33 = vadd.f32 %v825_v29, %v322_v25  ;;  %v995_v34 = vadd.f32 %v905_v30, %v354_v26  ;;  %v333_v27 = vld [vmem:[#allocation2 + $0x160] sm:$0xff] }
 0x1a1   : > { %v829_v35 = vpop.f32.mrf.mxu0  ;;  %v909_v36 = vpop.f32.mrf.mxu1  ;;  %v365_v28 = vld [vmem:[#allocation2 + $0xc0] sm:$0xff] }
 0x1a2   : > { %1027 = vst [vmem:[#allocation2 + $0x60] sm:$0xff] %v963_v33  ;;  %1059 = vst [vmem:[#allocation2 + $0xd0] sm:$0xff] %v995_v34  ;;  %v964_v39 = vadd.f32 %v829_v35, %v323_v31  ;;  %v996_v40 = vadd.f32 %v909_v36, %v355_v32  ;;  %v334_v33 = vld [vmem:[#allocation2 + $0x30] sm:$0xff]  ;;  %v366_v34 = vld [vmem:[#allocation2 + $0x1c0] sm:$0xff] }
 0x1a3   : > { %v831_v41 = vpop.f32.mrf.mxu0  ;;  %v911_v42 = vpop.f32.mrf.mxu1 }
 0x1a4   : > { %1028 = vst [vmem:[#allocation2 + $0xe0] sm:$0xff] %v964_v39  ;;  %1060 = vst [vmem:[#allocation2 + $0xb8] sm:$0xff] %v996_v40  ;;  %v965_v45 = vadd.f32 %v831_v41, %v324_v37  ;;  %v997_v46 = vadd.f32 %v911_v42, %v356_v38  ;;  %v335_v39 = vld [vmem:[#allocation2 + $0x1e0] sm:$0xff]  ;;  %v367_v40 = vld [vmem:[#allocation2 + $0x158] sm:$0xff] }
 0x1a5   : > { %v833_v47 = vpop.f32.mrf.mxu0  ;;  %v913_v48 = vpop.f32.mrf.mxu1 }
 0x1a6   : > { %1029 = vst [vmem:[#allocation2 + $0x188] sm:$0xff] %v965_v45  ;;  %1061 = vst [vmem:[#allocation2 + $0x88] sm:$0xff] %v997_v46  ;;  %v966_v51 = vadd.f32 %v833_v47, %v325_v43  ;;  %v998_v52 = vadd.f32 %v913_v48, %v357_v44  ;;  %v336_v45 = vld [vmem:[#allocation2] sm:$0xff]  ;;  %v368_v46 = vld [vmem:[#allocation2 + $0x10] sm:$0xff] }
 0x1a7   : > { %v835_v53 = vpop.f32.mrf.mxu0  ;;  %v915_v54 = vpop.f32.mrf.mxu1 }
 0x1a8   : > { %1030 = vst [vmem:[#allocation2 + $0x138] sm:$0xff] %v966_v51  ;;  %1062 = vst [vmem:[#allocation2 + $0xa8] sm:$0xff] %v998_v52  ;;  %v967_v57 = vadd.f32 %v835_v53, %v326_v49  ;;  %v999_v58 = vadd.f32 %v915_v54, %v358_v50  ;;  %v337_v51 = vld [vmem:[#allocation2 + $0xf0] sm:$0xff]  ;;  %v369_v52 = vld [vmem:[#allocation2 + $0x58] sm:$0xff] }
 0x1a9   : > { %v839_v59 = vpop.f32.mrf.mxu0  ;;  %v919_v60 = vpop.f32.mrf.mxu1 }
 0x1aa   : > { %1031 = vst [vmem:[#allocation2 + $0x140] sm:$0xff] %v967_v57  ;;  %1063 = vst [vmem:[#allocation2 + $0x1c8] sm:$0xff] %v999_v58  ;;  %v968_v63 = vadd.f32 %v839_v59, %v327_v55  ;;  %v1000_v0 = vadd.f32 %v919_v60, %v359_v56  ;;  %v338_v57 = vld [vmem:[#allocation2 + $0x8] sm:$0xff]  ;;  %v370_v58 = vld [vmem:[#allocation2 + $0xa0] sm:$0xff] }
 0x1ab   : > { %v841_v1 = vpop.f32.mrf.mxu0  ;;  %v921_v2 = vpop.f32.mrf.mxu1 }
 0x1ac   : > { %1032 = vst [vmem:[#allocation2 + $0x80] sm:$0xff] %v968_v63  ;;  %1064 = vst [vmem:[#allocation2 + $0x170] sm:$0xff] %v1000_v0  ;;  %v969_v5 = vadd.f32 %v841_v1, %v328_v61  ;;  %v1001_v6 = vadd.f32 %v921_v2, %v360_v62 }
 0x1ad   : > { %v843_v7 = vpop.f32.mrf.mxu0  ;;  %v923_v8 = vpop.f32.mrf.mxu1 }
 0x1ae   : > { %1033 = vst [vmem:[#allocation2 + $0x1a8] sm:$0xff] %v969_v5  ;;  %1065 = vst [vmem:[#allocation2 + $0x178] sm:$0xff] %v1001_v6  ;;  %v970_v11 = vadd.f32 %v843_v7, %v329_v3  ;;  %v1002_v12 = vadd.f32 %v923_v8, %v361_v4 }
 0x1af   : > { %v845_v13 = vpop.f32.mrf.mxu0  ;;  %v925_v14 = vpop.f32.mrf.mxu1 }
 0x1b0   : > { %1034 = vst [vmem:[#allocation2 + $0x1b8] sm:$0xff] %v970_v11  ;;  %1066 = vst [vmem:[#allocation2 + $0x68] sm:$0xff] %v1002_v12  ;;  %v971_v17 = vadd.f32 %v845_v13, %v330_v9  ;;  %v1003_v18 = vadd.f32 %v925_v14, %v362_v10 }
 0x1b1   : > { %v849_v19 = vpop.f32.mrf.mxu0  ;;  %v929_v20 = vpop.f32.mrf.mxu1 }
 0x1b2   : > { %1035 = vst [vmem:[#allocation2 + $0x28] sm:$0xff] %v971_v17  ;;  %1067 = vst [vmem:[#allocation2 + $0x190] sm:$0xff] %v1003_v18  ;;  %v972_v23 = vadd.f32 %v849_v19, %v331_v15  ;;  %v1004_v24 = vadd.f32 %v929_v20, %v363_v16 }
 0x1b3   : > { %v851_v25 = vpop.f32.mrf.mxu0  ;;  %v931_v26 = vpop.f32.mrf.mxu1 }
 0x1b4   : > { %1036 = vst [vmem:[#allocation2 + $0x1e8] sm:$0xff] %v972_v23  ;;  %1068 = vst [vmem:[#allocation2 + $0x198] sm:$0xff] %v1004_v24  ;;  %v973_v29 = vadd.f32 %v851_v25, %v332_v21  ;;  %v1005_v30 = vadd.f32 %v931_v26, %v364_v22 }
 0x1b5   : > { %v853_v31 = vpop.f32.mrf.mxu0  ;;  %v933_v32 = vpop.f32.mrf.mxu1 }
 0x1b6   : > { %1037 = vst [vmem:[#allocation2 + $0xf8] sm:$0xff] %v973_v29  ;;  %1069 = vst [vmem:[#allocation2 + $0x38] sm:$0xff] %v1005_v30  ;;  %v974_v35 = vadd.f32 %v853_v31, %v333_v27  ;;  %v1006_v36 = vadd.f32 %v933_v32, %v365_v28 }
 0x1b7   : > { %v855_v37 = vpop.f32.mrf.mxu0  ;;  %v935_v38 = vpop.f32.mrf.mxu1 }
 0x1b8   : > { %1038 = vst [vmem:[#allocation2 + $0x160] sm:$0xff] %v974_v35  ;;  %1070 = vst [vmem:[#allocation2 + $0xc0] sm:$0xff] %v1006_v36  ;;  %v975_v41 = vadd.f32 %v855_v37, %v334_v33  ;;  %v1007_v42 = vadd.f32 %v935_v38, %v366_v34 }
 0x1b9   : > { %v859_v43 = vpop.f32.mrf.mxu0  ;;  %v939_v44 = vpop.f32.mrf.mxu1 }
 0x1ba   : > { %1039 = vst [vmem:[#allocation2 + $0x30] sm:$0xff] %v975_v41  ;;  %1071 = vst [vmem:[#allocation2 + $0x1c0] sm:$0xff] %v1007_v42  ;;  %v976_v47 = vadd.f32 %v859_v43, %v335_v39  ;;  %v1008_v48 = vadd.f32 %v939_v44, %v367_v40 }
 0x1bb   : > { %v861_v49 = vpop.f32.mrf.mxu0  ;;  %v941_v50 = vpop.f32.mrf.mxu1 }
 0x1bc   : > { %1040 = vst [vmem:[#allocation2 + $0x1e0] sm:$0xff] %v976_v47  ;;  %1072 = vst [vmem:[#allocation2 + $0x158] sm:$0xff] %v1008_v48  ;;  %v977_v53 = vadd.f32 %v861_v49, %v336_v45  ;;  %v1009_v54 = vadd.f32 %v941_v50, %v368_v46 }
 0x1bd   : > { %v863_v55 = vpop.f32.mrf.mxu0  ;;  %v943_v56 = vpop.f32.mrf.mxu1 }
 0x1be   : > { %1041 = vst [vmem:[#allocation2] sm:$0xff] %v977_v53  ;;  %1073 = vst [vmem:[#allocation2 + $0x10] sm:$0xff] %v1009_v54  ;;  %v978_v59 = vadd.f32 %v863_v55, %v337_v51  ;;  %v1010_v60 = vadd.f32 %v943_v56, %v369_v52  ;;  %1079 = sbr.rel (%p1585_p4) target bundleno = 478 (0x1de), region = 44 }
 0x1bf   : > { %v865_v61 = vpop.f32.mrf.mxu0  ;;  %v945_v62 = vpop.f32.mrf.mxu1 }
 0x1c0   : > { %1042 = vst [vmem:[#allocation2 + $0xf0] sm:$0xff] %v978_v59  ;;  %1074 = vst [vmem:[#allocation2 + $0x58] sm:$0xff] %v1010_v60  ;;  %v979_v63 = vadd.f32 %v865_v61, %v338_v57  ;;  %v1011_v0 = vadd.f32 %v945_v62, %v370_v58 }
 0x1c2   : > { %1043 = vst [vmem:[#allocation2 + $0x8] sm:$0xff] %v979_v63  ;;  %1075 = vst [vmem:[#allocation2 + $0xa0] sm:$0xff] %v1011_v0 }
 0x1c3   : > { %v1080_v1 = vld [vmem:[#allocation2 + $0xb0] sm:$0xff]  ;;  %v1082_v3 = vld [vmem:[#allocation2 + $0xd8] sm:$0xff]  ;;  %v1085_v7 = vld [vmem:[#allocation2 + $0x168] sm:$0xff] }
 0x1c4   : > { %v1081_v2 = vld [vmem:[#allocation2 + $0x1b0] sm:$0xff]  ;;  %v1083_v5 = vld [vmem:[#allocation2 + $0x18] sm:$0xff]  ;;  %v1087_v11 = vld [vmem:[#allocation2 + $0x48] sm:$0xff] }
 0x1c5   : > { %v1624_v4 = vpack.c.bf16 %v1081_v2, %v1080_v1  ;;  %v1084_v6 = vld [vmem:[#allocation2 + $0x50] sm:$0xff]  ;;  %v1625_v8 = vpack.c.bf16 %v1083_v5, %v1082_v3  ;;  %v1088_v12 = vld [vmem:[#allocation2 + $0x180] sm:$0xff]  ;;  %v1090_v15 = vld [vmem:[#allocation2 + $0x118] sm:$0xff] }
 0x1c6   : > { %v1626_v9 = vpack.c.bf16 %v1085_v7, %v1084_v6  ;;  %v1086_v10 = vld [vmem:[#allocation2 + $0x130] sm:$0xff]  ;;  %v1091_v16 = vld [vmem:[#allocation2 + $0x98] sm:$0xff]  ;;  %v1092_v19 = vld [vmem:[#allocation2 + $0x120] sm:$0xff] }
 0x1c7   : > { %1336 = vst [vmem:[%s2381_s17] sm:$0xff] %v1624_v4  ;;  %v1627_v13 = vpack.c.bf16 %v1087_v11, %v1086_v10  ;;  %v1089_v14 = vld [vmem:[#allocation2 + $0x110] sm:$0xff]  ;;  %1337 = vst [vmem:[%s2381_s17 + $0x8] sm:$0xff] %v1625_v8  ;;  %v1629_v18 = vpack.c.bf16 %v1091_v16, %v1090_v15  ;;  %v1094_v21 = vld [vmem:[#allocation2 + $0x108] sm:$0xff] }
 0x1c8   : > { %1338 = vst [vmem:[%s2381_s17 + $0x10] sm:$0xff] %v1626_v9  ;;  %v1628_v17 = vpack.c.bf16 %v1089_v14, %v1088_v12  ;;  %v1093_v20 = vld [vmem:[#allocation2 + $0x150] sm:$0xff]  ;;  %v1095_v23 = vld [vmem:[#allocation2 + $0x60] sm:$0xff]  ;;  %v1097_v25 = vld [vmem:[#allocation2 + $0x188] sm:$0xff] }
 0x1c9   : > { %1339 = vst [vmem:[%s2381_s17 + $0x18] sm:$0xff] %v1627_v13  ;;  %v1630_v22 = vpack.c.bf16 %v1093_v20, %v1092_v19  ;;  %v1096_v24 = vld [vmem:[#allocation2 + $0xe0] sm:$0xff]  ;;  %1341 = vst [vmem:[%s2381_s17 + $0x28] sm:$0xff] %v1629_v18  ;;  %v1631_v26 = vpack.c.bf16 %v1095_v23, %v1094_v21  ;;  %v1098_v28 = vld [vmem:[#allocation2 + $0x138] sm:$0xff] }
 0x1ca   : > { %1340 = vst [vmem:[%s2381_s17 + $0x20] sm:$0xff] %v1628_v17  ;;  %v1632_v27 = vpack.c.bf16 %v1097_v25, %v1096_v24  ;;  %v1099_v29 = vld [vmem:[#allocation2 + $0x140] sm:$0xff]  ;;  %v1101_v32 = vld [vmem:[#allocation2 + $0x1a8] sm:$0xff]  ;;  %v1102_v33 = vld [vmem:[#allocation2 + $0x1b8] sm:$0xff] }
 0x1cb   : > { %v1100_v30 = vld [vmem:[#allocation2 + $0x80] sm:$0xff]  ;;  %1342 = vst [vmem:[%s2381_s17 + $0x30] sm:$0xff] %v1630_v22  ;;  %v1633_v31 = vpack.c.bf16 %v1099_v29, %v1098_v28  ;;  %v1103_v34 = vld [vmem:[#allocation2 + $0x28] sm:$0xff]  ;;  %1343 = vst [vmem:[%s2381_s17 + $0x38] sm:$0xff] %v1631_v26 }
 0x1cc   : > { %1344 = vst [vmem:[%s2381_s17 + $0x40] sm:$0xff] %v1632_v27  ;;  %v1634_v35 = vpack.c.bf16 %v1101_v32, %v1100_v30  ;;  %v1635_v36 = vpack.c.bf16 %v1103_v34, %v1102_v33  ;;  %v1104_v37 = vld [vmem:[#allocation2 + $0x1e8] sm:$0xff]  ;;  %v1105_v38 = vld [vmem:[#allocation2 + $0xf8] sm:$0xff]  ;;  %v1106_v39 = vld [vmem:[#allocation2 + $0x160] sm:$0xff] }
 0x1cd   : > { %1345 = vst [vmem:[%s2381_s17 + $0x48] sm:$0xff] %v1633_v31  ;;  %v1636_v40 = vpack.c.bf16 %v1105_v38, %v1104_v37  ;;  %v1107_v41 = vld [vmem:[#allocation2 + $0x30] sm:$0xff]  ;;  %v1108_v42 = vld [vmem:[#allocation2 + $0x1e0] sm:$0xff]  ;;  %v1111_v47 = vld [vmem:[#allocation2 + $0x8] sm:$0xff] }
 0x1ce   : > { %v1109_v43 = vld [vmem:[#allocation2] sm:$0xff]  ;;  %1346 = vst [vmem:[%s2381_s17 + $0x50] sm:$0xff] %v1634_v35  ;;  %1347 = vst [vmem:[%s2381_s17 + $0x58] sm:$0xff] %v1635_v36  ;;  %v1637_v44 = vpack.c.bf16 %v1107_v41, %v1106_v39  ;;  %v1110_v46 = vld [vmem:[#allocation2 + $0xf0] sm:$0xff] }
 0x1cf   : > { %v1638_v45 = vpack.c.bf16 %v1109_v43, %v1108_v42  ;;  %v1112_v48 = vld [vmem:[#allocation2 + $0x148] sm:$0xff]  ;;  %1348 = vst [vmem:[%s2381_s17 + $0x60] sm:$0xff] %v1636_v40  ;;  %v1639_v49 = vpack.c.bf16 %v1111_v47, %v1110_v46  ;;  %v1113_v50 = vld [vmem:[#allocation2 + $0x1d0] sm:$0xff]  ;;  %v1114_v51 = vld [vmem:[#allocation2 + $0x100] sm:$0xff] }
 0x1d0   : > { %v1115_v52 = vld [vmem:[#allocation2 + $0xc8] sm:$0xff]  ;;  %1349 = vst [vmem:[%s2381_s17 + $0x68] sm:$0xff] %v1637_v44  ;;  %v1640_v53 = vpack.c.bf16 %v1113_v50, %v1112_v48  ;;  %v1116_v55 = vld [vmem:[#allocation2 + $0x40] sm:$0xff]  ;;  %v1117_v56 = vld [vmem:[#allocation2 + $0x1f8] sm:$0xff] }
 0x1d1   : > { %1350 = vst [vmem:[%s2381_s17 + $0x70] sm:$0xff] %v1638_v45  ;;  %v1641_v54 = vpack.c.bf16 %v1115_v52, %v1114_v51  ;;  %v1118_v57 = vld [vmem:[#allocation2 + $0x20] sm:$0xff]  ;;  %1351 = vst [vmem:[%s2381_s17 + $0x78] sm:$0xff] %v1639_v49  ;;  %v1642_v58 = vpack.c.bf16 %v1117_v56, %v1116_v55  ;;  %v1119_v59 = vld [vmem:[#allocation2 + $0x128] sm:$0xff] }
 0x1d2   : > { %v1120_v60 = vld [vmem:[#allocation2 + $0x1a0] sm:$0xff]  ;;  %v1121_v61 = vld [vmem:[#allocation2 + $0x1f0] sm:$0xff]  ;;  %1352 = vst [vmem:[%s2381_s17 + $0x80] sm:$0xff] %v1640_v53  ;;  %v1643_v62 = vpack.c.bf16 %v1119_v59, %v1118_v57  ;;  %v1122_v0 = vld [vmem:[#allocation2 + $0xe8] sm:$0xff] }
 0x1d3   : > { %1353 = vst [vmem:[%s2381_s17 + $0x88] sm:$0xff] %v1641_v54  ;;  %v1644_v63 = vpack.c.bf16 %v1121_v61, %v1120_v60  ;;  %v1123_v1 = vld [vmem:[#allocation2 + $0x78] sm:$0xff]  ;;  %v1124_v2 = vld [vmem:[#allocation2 + $0x70] sm:$0xff]  ;;  %1354 = vst [vmem:[%s2381_s17 + $0x90] sm:$0xff] %v1642_v58 }
 0x1d4   : > { %v1645_v3 = vpack.c.bf16 %v1123_v1, %v1122_v0  ;;  %v1125_v4 = vld [vmem:[#allocation2 + $0x90] sm:$0xff]  ;;  %v1126_v5 = vld [vmem:[#allocation2 + $0x1d8] sm:$0xff]  ;;  %1355 = vst [vmem:[%s2381_s17 + $0x98] sm:$0xff] %v1643_v62  ;;  %v1129_v10 = vld [vmem:[#allocation2 + $0x88] sm:$0xff] }
 0x1d5   : > { %v1127_v6 = vld [vmem:[#allocation2 + $0xd0] sm:$0xff]  ;;  %1356 = vst [vmem:[%s2381_s17 + $0xa0] sm:$0xff] %v1644_v63  ;;  %v1646_v7 = vpack.c.bf16 %v1125_v4, %v1124_v2  ;;  %v1128_v9 = vld [vmem:[#allocation2 + $0xb8] sm:$0xff]  ;;  %v1130_v11 = vld [vmem:[#allocation2 + $0xa8] sm:$0xff] }
 0x1d6   : > { %v1647_v8 = vpack.c.bf16 %v1127_v6, %v1126_v5  ;;  %1357 = vst [vmem:[%s2381_s17 + $0xa8] sm:$0xff] %v1645_v3  ;;  %v1648_v12 = vpack.c.bf16 %v1129_v10, %v1128_v9  ;;  %v1131_v13 = vld [vmem:[#allocation2 + $0x1c8] sm:$0xff]  ;;  %v1132_v14 = vld [vmem:[#allocation2 + $0x170] sm:$0xff]  ;;  %v1133_v15 = vld [vmem:[#allocation2 + $0x178] sm:$0xff] }
 0x1d7   : > { %1358 = vst [vmem:[%s2381_s17 + $0xb0] sm:$0xff] %v1646_v7  ;;  %v1649_v16 = vpack.c.bf16 %v1131_v13, %v1130_v11  ;;  %v1650_v17 = vpack.c.bf16 %v1133_v15, %v1132_v14  ;;  %v1134_v18 = vld [vmem:[#allocation2 + $0x68] sm:$0xff]  ;;  %v1135_v19 = vld [vmem:[#allocation2 + $0x190] sm:$0xff]  ;;  %v1136_v20 = vld [vmem:[#allocation2 + $0x198] sm:$0xff] }
 0x1d8   : > { %1359 = vst [vmem:[%s2381_s17 + $0xb8] sm:$0xff] %v1647_v8  ;;  %1360 = vst [vmem:[%s2381_s17 + $0xc0] sm:$0xff] %v1648_v12  ;;  %v1651_v21 = vpack.c.bf16 %v1135_v19, %v1134_v18  ;;  %v1137_v22 = vld [vmem:[#allocation2 + $0x38] sm:$0xff]  ;;  %v1138_v23 = vld [vmem:[#allocation2 + $0xc0] sm:$0xff] }
 0x1d9   : > { %v1139_v24 = vld [vmem:[#allocation2 + $0x1c0] sm:$0xff]  ;;  %1361 = vst [vmem:[%s2381_s17 + $0xc8] sm:$0xff] %v1649_v16  ;;  %1362 = vst [vmem:[%s2381_s17 + $0xd0] sm:$0xff] %v1650_v17  ;;  %v1652_v25 = vpack.c.bf16 %v1137_v22, %v1136_v20  ;;  %v1140_v27 = vld [vmem:[#allocation2 + $0x158] sm:$0xff] }
 0x1da   : > { %v1653_v26 = vpack.c.bf16 %v1139_v24, %v1138_v23  ;;  %v1141_v28 = vld [vmem:[#allocation2 + $0x10] sm:$0xff]  ;;  %v1142_v29 = vld [vmem:[#allocation2 + $0x58] sm:$0xff]  ;;  %1363 = vst [vmem:[%s2381_s17 + $0xd8] sm:$0xff] %v1651_v21  ;;  %v1143_v31 = vld [vmem:[#allocation2 + $0xa0] sm:$0xff] }
 0x1db   : > { %v1654_v30 = vpack.c.bf16 %v1141_v28, %v1140_v27  ;;  %1364 = vst [vmem:[%s2381_s17 + $0xe0] sm:$0xff] %v1652_v25  ;;  %v1655_v32 = vpack.c.bf16 %v1143_v31, %v1142_v29 }
 0x1dc   : > { %1365 = vst [vmem:[%s2381_s17 + $0xe8] sm:$0xff] %v1653_v26 }
 0x1dd   : > { %1366 = vst [vmem:[%s2381_s17 + $0xf0] sm:$0xff] %v1654_v30  ;;  %1367 = vst [vmem:[%s2381_s17 + $0xf8] sm:$0xff] %v1655_v32 }
 0x1de PF: > { %s2669_s18 = sld [smem:[#allocation13_spill]]  ;;  %s1385_s0 = sshll.u32 %s2381_s17, 4  ;;  %s2552_s0 = int_to_ptr.vmem [resolvable:$true] %s1385_s0 }
 0x1df   : > { %s2670_s28 = sld [smem:[#allocation20_spill]]  ;;  %s2556_s2 = scalar_lea.sflag [#allocation5], %s230_s4 }
 0x1e0   : > { %s1981_s5 = scalar_lea.vmem %s2552_s0, 4096  ;;  %s2138_s15 = smov [#allocation8]  }
 0x1e1   : > { %p1982_p7 = scmp.ne.s32.totalorder %s2552_s0, %s1981_s5  ;;  %s1985_s19 = sshll.u32 %s2138_s15, 4  ;;  %s1986_s19 = int_to_ptr.vmem [resolvable:$false] %s1985_s19 }
 0x1e2   : > { %s1987_s25 = scalar_lea.vmem %s1986_s19, 8192  ;;  %p1988_p0 = scmp.lt.s32.totalorder %s2552_s0, %s1986_s19 }
 0x1e3   : > { %p1983_p10 = pnand %p1982_p7, %p2328_p13  ;;  %p1989_p6 = scmp.lt.s32.totalorder %s1987_s25, %s1981_s5 }
 0x1e4   : > { %s1656_s3 = sshll.u32 %s2669_s18, 7 }
 0x1e5   : > { %s2549_s27 = scalar_lea.hbm %s2670_s28, %s1656_s3  ;;  %p1984_p12 = pneg %p1983_p10 }
 0x1e6   : > { %p1990_p9 = por %p1989_p6, %p1988_p0 }
 0x1e8   : > { %p1991_p1 = pnand %p1990_p9, %p1984_p12 }
 0x1ea   : > { %1994 = shalt.err (!%p1991_p1)
}
 0x1eb   : > { %s1995_s21 = scalar_lea.hbm %s2549_s27, 4096  ;;  %s1999_s8 = scalar_lea.hbm %s2670_s28, 24576 }
 0x1ec   : > { %p1996_p2 = scmp.ne.s32.totalorder %s2549_s27, %s1995_s21  ;;  %p2000_p8 = scmp.lt.s32.totalorder %s2549_s27, %s2670_s28 }
 0x1ed   : > { %p2001_p4 = scmp.lt.s32.totalorder %s1999_s8, %s1995_s21 }
 0x1ee   : > { %p1997_p3 = pnand %p1996_p2, %p2328_p13 }
 0x1ef   : > { %p2002_p7 = por %p2001_p4, %p2000_p8 }
 0x1f0   : > { %p1998_p11 = pneg %p1997_p3 }
 0x1f2   : > { %p2003_p10 = pnand %p2002_p7, %p1998_p11 }
 0x1f4   : > { %2006 = shalt.err (!%p2003_p10)
}
 0x1f5   : > { %s2139_s17 = smov 128   ;;  %s2140_s18 = smov 768  }
 0x1f6   : > { %s2141_s3 = smov 8  }
 0x1f7   : > { %1694 = dma.vmem_to_hbm [thread:$0]  (%p2328_p13), %s2552_s0, 4096, %s2549_s27, %s2556_s2, %s2139_s17, %s2140_s18, %s2141_s3  }
 0x1f8 PF: > { %p1708_p12 = scmp.ge.s32.totalorder %s2129_s22, 2  ;;  %s1400_s23 = sand.u32 1, %s2077_s9  }
 0x1f9   : > { %s1401_s24 = scalar_lea.sflag [#allocation5], %s1400_s23 }
 0x1fa   : > { %p1704_p0 = pnand %p1708_p12, %p2338_p5 }
 0x1fc   : > { %p1705_p6 = pneg %p1704_p0 }
 0x1fe   : > { %2072 = dma.done.wait (%p1705_p6), %s1401_s24, 4096  }
 0x1ff   : > { %2074 = vsyncadd (%p1705_p6), %s1401_s24, 4294963200  ;;  %s21_s22 = sadd.s32 1, %s2129_s22   ;;  %s2672_s29 = sld [smem:[#allocation18_spill]] }
 0x200   : > { %p2584_p9 = scmp.ge.s32.totalorder %s21_s22, 14   ;;  %s2673_s27 = sld [smem:[#allocation12_spill]] }
 0x201   : > { %s2674_s17 = sld [smem:[#allocation16_spill]]  ;;  %s2678_s9 = smov %s2081_s10 }
 0x202   : > { %s2675_s19 = sld [smem:[#allocation14_spill]]  ;;  %s2679_s10 = smov %s2085_s11 }
 0x203   : > { %s2676_s6 = sld [smem:[#allocation15_spill]]  ;;  %s2680_s11 = smov %s2333_s26 }
 0x204   : > { %s2677_s21 = sld [smem:[#allocation17_spill]]  ;;  %s2681_s12 = smov %s2093_s13 }
 0x205   : > { %s2682_s13 = smov %s2097_s14  ;;  %s2683_s14 = smov %s2672_s29 }
 0x206   : > { %s2684_s15 = smov %s2105_s16  ;;  %s2685_s16 = smov %s2673_s27 }
 0x207   : > { %s2686_s18 = smov %s2121_s20  ;;  %20 = sbr.rel (!%p2584_p9) target bundleno = 15 (0xf), region = 94 }
 0x209   : > { %s2687_s20 = smov %s2676_s6 }
 0x20c   :  { %1406 = vsyncpa [#allocation4], 1 }
 0x20d   :  { %1408 = vsyncpa [#allocation4 + $0x1], 1 }
 0x20e   :  { %1409 = vsyncpa [#allocation7], 1 }
 0x20f   :  { %1411 = vsyncpa [#allocation7 + $0x1], 1 }
 0x210   :  { %1412 = vsyncpa [#allocation5], 1 }
 0x211   :  { %1414 = vsyncpa [#allocation5 + $0x1], 1 }

</bundles_post_ra>
